<compile_context>
chip_gen: v7x
topology: tpu7x:2x2x1
jax: 0.10.0
libtpu: 0.0.40
codegen_flags: <defaults>
</compile_context>

<pallas_src>
import functools

import jax
import jax.numpy as jnp
from jax.experimental import pallas as pl
from jax.experimental.pallas import tpu as pltpu


def _round_up(n, m):
    return ((n + m - 1) // m) * m


def _embedding_kernel(x_ref, *refs, num_layers, eps, batch, slope):
    """Fused EmbeddingLayer: for each layer, y = BN(leaky_relu(y @ W + b))."""
    o_ref = refs[-1]
    param_refs = refs[:-1]          # per layer: (W_pad, stacked[b;gamma;beta])

    y = x_ref[...]                  # (B_pad, D0_pad) f32, lives in vregs/VMEM
    b_pad = y.shape[0]
    inv_n = 1.0 / float(batch)

    for l in range(num_layers):     # static unroll over layers
        w = param_refs[2 * l][...]              # (Din_pad, Dout_pad)
        pv = param_refs[2 * l + 1][...]         # (3, Dout_pad): b, gamma, beta
        bias, gamma, beta = pv[0:1, :], pv[1:2, :], pv[2:3, :]

        # Linear (MXU) + bias
        y = jnp.dot(y, w, preferred_element_type=jnp.float32) + bias

        # LeakyReLU(0.1) as a single vmax
        y = jnp.maximum(y, slope * y)

        # BatchNorm1d (training mode): per-feature batch mean / biased var.
        if b_pad == batch:
            mean = jnp.sum(y, axis=0, keepdims=True) * inv_n
            yc = y - mean
            var = jnp.sum(yc * yc, axis=0, keepdims=True) * inv_n
        else:
            # Batch was padded to a sublane multiple: mask out padded rows.
            row = jax.lax.broadcasted_iota(jnp.int32, y.shape, 0)
            mask = (row < batch).astype(jnp.float32)
            mean = jnp.sum(y * mask, axis=0, keepdims=True) * inv_n
            yc = y - mean
            var = jnp.sum((yc * yc) * mask, axis=0, keepdims=True) * inv_n

        y = yc * jax.lax.rsqrt(var + eps) * gamma + beta

    o_ref[...] = y


def embedding_layer_forward(x, params, *, eps=1e-5):
    """x: (B, Din) f32; params: list of (W (Din,Dout), b, gamma, beta) each (1,Dout)."""
    B, din = x.shape
    num_layers = len(params)
    dims = [din] + [w.shape[1] for (w, _, _, _) in params]
    dims_pad = [_round_up(d, 128) for d in dims]    # lane-dense feature dims
    b_pad = _round_up(B, 8)                         # sublane-aligned batch

    # Zero-pad input and parameters (zeros keep the math exact; padded output
    # columns come out as 0 and are sliced away below).
    x_p = jnp.zeros((b_pad, dims_pad[0]), jnp.float32).at[:B, :din].set(x)

    flat_inputs = [x_p]
    for l, (w, b, gamma, beta) in enumerate(params):
        din_p, dout_p = dims_pad[l], dims_pad[l + 1]
        w_p = jnp.zeros((din_p, dout_p), jnp.float32).at[: w.shape[0], : w.shape[1]].set(w)
        pv = jnp.zeros((3, dout_p), jnp.float32)
        pv = pv.at[0, : b.shape[1]].set(b[0])
        pv = pv.at[1, : gamma.shape[1]].set(gamma[0])
        pv = pv.at[2, : beta.shape[1]].set(beta[0])
        flat_inputs += [w_p, pv]

    kernel = functools.partial(
        _embedding_kernel, num_layers=num_layers, eps=eps, batch=B, slope=0.1
    )

    vmem_spec = pl.BlockSpec(memory_space=pltpu.MemorySpace.VMEM)
    out_p = pl.pallas_call(
        kernel,
        out_shape=jax.ShapeDtypeStruct((b_pad, dims_pad[-1]), jnp.float32),
        in_specs=[vmem_spec] * len(flat_inputs),
        out_specs=vmem_spec,
    )(*flat_inputs)

    return out_p[:B, : dims[-1]]


def init_embedding_params(key, input_dim, embedding_dims):
    """Deterministic parameter init mirroring the PyTorch module's shapes."""
    input_dims = [input_dim] + list(embedding_dims[:-1])
    params = []
    for din, dout in zip(input_dims, embedding_dims):
        kw, kb, key = jax.random.split(key, 3)
        bound = 1.0 / jnp.sqrt(jnp.float32(din))
        # nn.Linear-style uniform init; stored transposed as (Din, Dout).
        w = jax.random.uniform(kw, (din, dout), jnp.float32, -bound, bound)
        b = jax.random.uniform(kb, (1, dout), jnp.float32, -bound, bound)
        gamma = jnp.ones((1, dout), jnp.float32)   # BatchNorm1d default weight
        beta = jnp.zeros((1, dout), jnp.float32)   # BatchNorm1d default bias
        params.append((w, b, gamma, beta))
    return params


def _reference_forward(x, params, eps=1e-5):
    out = x
    for (w, b, gamma, beta) in params:
        y = out @ w + b
        y = jnp.where(y > 0, y, 0.1 * y)
        mean = jnp.mean(y, axis=0, keepdims=True)
        var = jnp.mean((y - mean) ** 2, axis=0, keepdims=True)
        out = (y - mean) / jnp.sqrt(var + eps) * gamma + beta
    return out


if __name__ == "__main__":
    key = jax.random.PRNGKey(0)
    kx, kp = jax.random.split(key)

    B = 8            # batch (>=2 so training-mode batchnorm is well defined)
    input_dim = 32
    embedding_dims = (64, 32)   # chain of two _Fc_layer blocks

    x = jax.random.normal(kx, (B, input_dim), jnp.float32)
    params = init_embedding_params(kp, input_dim, embedding_dims)

    out = embedding_layer_forward(x, params)
    out = jax.block_until_ready(out)

    ref = _reference_forward(x, params)
    assert out.shape == (B, embedding_dims[-1])
    assert jnp.allclose(out, ref, atol=1e-4, rtol=1e-4), float(
        jnp.max(jnp.abs(out - ref))
    )

    print("KERNEL_OK")
</pallas_src>

<mosaic_0001>
module attributes {stable_mosaic.version = 11 : i64} {
  func.func @_embedding_kernel(%arg0: memref<8x128xf32, #tpu.memory_space<vmem>>, %arg1: memref<128x128xf32, #tpu.memory_space<vmem>>, %arg2: memref<3x128xf32, #tpu.memory_space<vmem>>, %arg3: memref<128x128xf32, #tpu.memory_space<vmem>>, %arg4: memref<3x128xf32, #tpu.memory_space<vmem>>, %arg5: memref<8x128xf32, #tpu.memory_space<vmem>>) attributes {dimension_semantics = [], scalar_prefetch = 0 : i64, scratch_operands = 0 : i64, tpu.core_type = #tpu.core_type<tc>} {
    %c0 = arith.constant 0 : index
    %c0_0 = arith.constant 0 : index
    %0 = vector.load %arg0[%c0, %c0_0] : memref<8x128xf32, #tpu.memory_space<vmem>>, vector<8x128xf32>
    %c0_1 = arith.constant 0 : index
    %c0_2 = arith.constant 0 : index
    %1 = vector.load %arg1[%c0_1, %c0_2] : memref<128x128xf32, #tpu.memory_space<vmem>>, vector<128x128xf32>
    %c0_3 = arith.constant 0 : index
    %c0_4 = arith.constant 0 : index
    %2 = vector.load %arg2[%c0_3, %c0_4] : memref<3x128xf32, #tpu.memory_space<vmem>>, vector<3x128xf32>
    %3 = vector.extract_strided_slice %2 {offsets = [0, 0], sizes = [1, 128], strides = [1, 1]} : vector<3x128xf32> to vector<1x128xf32>
    %4 = vector.extract_strided_slice %2 {offsets = [1, 0], sizes = [1, 128], strides = [1, 1]} : vector<3x128xf32> to vector<1x128xf32>
    %5 = vector.extract_strided_slice %2 {offsets = [2, 0], sizes = [1, 128], strides = [1, 1]} : vector<3x128xf32> to vector<1x128xf32>
    %cst = arith.constant dense<0.000000e+00> : vector<8x128xf32>
    %6 = tpu.matmul %0, %1, %cst {dimension_numbers = #tpu.dot_dimension_numbers<[1], [0], [0], [1], [0, 0, 1, 1], [], []>} : vector<8x128xf32>, vector<128x128xf32>, vector<8x128xf32> -> vector<8x128xf32>
    %7 = vector.broadcast %3 : vector<1x128xf32> to vector<8x128xf32>
    %8 = arith.addf %6, %7 : vector<8x128xf32>
    %cst_5 = arith.constant 1.000000e-01 : f32
    %9 = vector.broadcast %cst_5 : f32 to vector<8x128xf32>
    %10 = arith.mulf %9, %8 : vector<8x128xf32>
    %11 = arith.maximumf %8, %10 : vector<8x128xf32>
    %cst_6 = arith.constant dense<0.000000e+00> : vector<128xf32>
    %12 = vector.multi_reduction <add>, %11, %cst_6 [0] : vector<8x128xf32> to vector<128xf32>
    %13 = vector.shape_cast %12 : vector<128xf32> to vector<1x128xf32>
    %cst_7 = arith.constant 1.250000e-01 : f32
    %14 = vector.broadcast %cst_7 : f32 to vector<1x128xf32>
    %15 = arith.mulf %13, %14 : vector<1x128xf32>
    %16 = vector.broadcast %15 : vector<1x128xf32> to vector<8x128xf32>
    %17 = arith.subf %11, %16 : vector<8x128xf32>
    %18 = arith.mulf %17, %17 : vector<8x128xf32>
    %cst_8 = arith.constant dense<0.000000e+00> : vector<128xf32>
    %19 = vector.multi_reduction <add>, %18, %cst_8 [0] : vector<8x128xf32> to vector<128xf32>
    %20 = vector.shape_cast %19 : vector<128xf32> to vector<1x128xf32>
    %cst_9 = arith.constant 1.250000e-01 : f32
    %21 = vector.broadcast %cst_9 : f32 to vector<1x128xf32>
    %22 = arith.mulf %20, %21 : vector<1x128xf32>
    %cst_10 = arith.constant 9.99999974E-6 : f32
    %23 = vector.broadcast %cst_10 : f32 to vector<1x128xf32>
    %24 = arith.addf %22, %23 : vector<1x128xf32>
    %25 = math.rsqrt %24 : vector<1x128xf32>
    %26 = vector.broadcast %25 : vector<1x128xf32> to vector<8x128xf32>
    %27 = arith.mulf %17, %26 : vector<8x128xf32>
    %28 = vector.broadcast %4 : vector<1x128xf32> to vector<8x128xf32>
    %29 = arith.mulf %27, %28 : vector<8x128xf32>
    %30 = vector.broadcast %5 : vector<1x128xf32> to vector<8x128xf32>
    %31 = arith.addf %29, %30 : vector<8x128xf32>
    %c0_11 = arith.constant 0 : index
    %c0_12 = arith.constant 0 : index
    %32 = vector.load %arg3[%c0_11, %c0_12] : memref<128x128xf32, #tpu.memory_space<vmem>>, vector<128x128xf32>
    %c0_13 = arith.constant 0 : index
    %c0_14 = arith.constant 0 : index
    %33 = vector.load %arg4[%c0_13, %c0_14] : memref<3x128xf32, #tpu.memory_space<vmem>>, vector<3x128xf32>
    %34 = vector.extract_strided_slice %33 {offsets = [0, 0], sizes = [1, 128], strides = [1, 1]} : vector<3x128xf32> to vector<1x128xf32>
    %35 = vector.extract_strided_slice %33 {offsets = [1, 0], sizes = [1, 128], strides = [1, 1]} : vector<3x128xf32> to vector<1x128xf32>
    %36 = vector.extract_strided_slice %33 {offsets = [2, 0], sizes = [1, 128], strides = [1, 1]} : vector<3x128xf32> to vector<1x128xf32>
    %cst_15 = arith.constant dense<0.000000e+00> : vector<8x128xf32>
    %37 = tpu.matmul %31, %32, %cst_15 {dimension_numbers = #tpu.dot_dimension_numbers<[1], [0], [0], [1], [0, 0, 1, 1], [], []>} : vector<8x128xf32>, vector<128x128xf32>, vector<8x128xf32> -> vector<8x128xf32>
    %38 = vector.broadcast %34 : vector<1x128xf32> to vector<8x128xf32>
    %39 = arith.addf %37, %38 : vector<8x128xf32>
    %cst_16 = arith.constant 1.000000e-01 : f32
    %40 = vector.broadcast %cst_16 : f32 to vector<8x128xf32>
    %41 = arith.mulf %40, %39 : vector<8x128xf32>
    %42 = arith.maximumf %39, %41 : vector<8x128xf32>
    %cst_17 = arith.constant dense<0.000000e+00> : vector<128xf32>
    %43 = vector.multi_reduction <add>, %42, %cst_17 [0] : vector<8x128xf32> to vector<128xf32>
    %44 = vector.shape_cast %43 : vector<128xf32> to vector<1x128xf32>
    %cst_18 = arith.constant 1.250000e-01 : f32
    %45 = vector.broadcast %cst_18 : f32 to vector<1x128xf32>
    %46 = arith.mulf %44, %45 : vector<1x128xf32>
    %47 = vector.broadcast %46 : vector<1x128xf32> to vector<8x128xf32>
    %48 = arith.subf %42, %47 : vector<8x128xf32>
    %49 = arith.mulf %48, %48 : vector<8x128xf32>
    %cst_19 = arith.constant dense<0.000000e+00> : vector<128xf32>
    %50 = vector.multi_reduction <add>, %49, %cst_19 [0] : vector<8x128xf32> to vector<128xf32>
    %51 = vector.shape_cast %50 : vector<128xf32> to vector<1x128xf32>
    %cst_20 = arith.constant 1.250000e-01 : f32
    %52 = vector.broadcast %cst_20 : f32 to vector<1x128xf32>
    %53 = arith.mulf %51, %52 : vector<1x128xf32>
    %cst_21 = arith.constant 9.99999974E-6 : f32
    %54 = vector.broadcast %cst_21 : f32 to vector<1x128xf32>
    %55 = arith.addf %53, %54 : vector<1x128xf32>
    %56 = math.rsqrt %55 : vector<1x128xf32>
    %57 = vector.broadcast %56 : vector<1x128xf32> to vector<8x128xf32>
    %58 = arith.mulf %48, %57 : vector<8x128xf32>
    %59 = vector.broadcast %35 : vector<1x128xf32> to vector<8x128xf32>
    %60 = arith.mulf %58, %59 : vector<8x128xf32>
    %61 = vector.broadcast %36 : vector<1x128xf32> to vector<8x128xf32>
    %62 = arith.addf %60, %61 : vector<8x128xf32>
    %c0_22 = arith.constant 0 : index
    %c0_23 = arith.constant 0 : index
    %63 = vector.load %arg5[%c0_22, %c0_23] : memref<8x128xf32, #tpu.memory_space<vmem>>, vector<8x128xf32>
    tpu.vector_store %arg5[%c0_22, %c0_23], %62 {strides = array<i32>} : memref<8x128xf32, #tpu.memory_space<vmem>>, vector<8x128xf32>,
    return
  }
}

</mosaic_0001>

<bundles_post_ra>
// kernel: tpu_custom_call.1
= control target key start
LH: loop header
LB: loop body
LE: loop exit
PB: predicated region body
PF: predicated region fallthrough
CT: control target
= control target key end

     0   :  { %10 = vsyncpa [#allocation3], 0  ;;  %s701_s0 = inlined_call_operand.hbm [shape: f32[8,128], index: 0, kind: input, shape index: {}]   ;;  %s702_s1 = inlined_call_operand.hbm [shape: f32[128,128], index: 1, kind: input, shape index: {}]   ;;  %s703_s2 = inlined_call_operand.vmem [shape: f32[3,128], index: 2, kind: input, shape index: {}]   ;;  %s704_s3 = inlined_call_operand.hbm [shape: f32[128,128], index: 3, kind: input, shape index: {}]   ;;  %s705_s4 = inlined_call_operand.vmem [shape: f32[3,128], index: 4, kind: input, shape index: {}]   ;;  %s706_s5 = inlined_call_operand.hbm [shape: f32[8,128], index: 5, kind: output, shape index: {}]  }
   0x1   :  { %11 = vsyncpa [#allocation6], 0 }
   0x2   :  { %12 = vsyncpa [#allocation4], 0  ;;  %s581_s18 = smov [#allocation5]   ;;  %s487_s22 = scalar_lea.hbm %s702_s1, 2048 }
   0x3   :  { %s28_s19 = sshll.u32 %s581_s18, 4  ;;  %p488_p0 = scmp.ne.s32.totalorder %s702_s1, %s487_s22  ;;  %s29_s19 = int_to_ptr.vmem [resolvable:$true] %s28_s19 }
   0x4   :  { %p491_p1 = scmp.lt.u32.totalorder %s487_s22, %s702_s1 }
   0x6   :  { %p493_p2 = pnand %p491_p1, %p488_p0 }
   0x8   :  { %496 = shalt.err (!%p493_p2)
}
   0x9   :  { %s497_s27 = scalar_lea.vmem %s29_s19, 2048  ;;  %p502_p4 = scmp.lt.s32.totalorder %s29_s19, %s29_s19 }
   0xa   :  { %p498_p3 = scmp.ne.s32.totalorder %s29_s19, %s497_s27  ;;  %p503_p5 = scmp.lt.s32.totalorder %s497_s27, %s497_s27 }
   0xc   :  { %p504_p6 = por %p503_p5, %p502_p4 }
   0xe   :  { %p505_p7 = pnand %p504_p6, %p498_p3 }
  0x10   :  { %508 = shalt.err (!%p505_p7)
}
  0x11   :  { %s582_s28 = smov 128   ;;  %s583_s29 = smov 8  }
  0x12   :  { %34 = dma.hbm_to_vmem [thread:$0]  %s702_s1, 2048, %s29_s19, [#allocation6], %s582_s28, %s582_s28, %s583_s29  }
  0x13   :  { %s584_s7 = smov [#allocation2]   ;;  %s585_s9 = smov [#allocation7]  }
  0x14   :  { %s19_s8 = sshll.u32 %s584_s7, 4  ;;  %s42_s10 = sshll.u32 %s585_s9, 4  ;;  %s20_s8 = int_to_ptr.vmem [resolvable:$true] %s19_s8  ;;  %s43_s10 = int_to_ptr.vmem [resolvable:$true] %s42_s10 }
  0x15   :  { %s509_s13 = scalar_lea.hbm %s701_s0, 128 }
  0x16   :  { %p510_p8 = scmp.ne.s32.totalorder %s701_s0, %s509_s13  ;;  %p513_p9 = scmp.lt.u32.totalorder %s509_s13, %s701_s0 }
  0x18   :  { %p515_p10 = pnand %p513_p9, %p510_p8 }
  0x1a   :  { %518 = shalt.err (!%p515_p10)
}
  0x1b   :  { %s519_s1 = scalar_lea.vmem %s20_s8, 128  ;;  %p524_p12 = scmp.lt.s32.totalorder %s20_s8, %s20_s8 }
  0x1c   :  { %p520_p11 = scmp.ne.s32.totalorder %s20_s8, %s519_s1  ;;  %p525_p13 = scmp.lt.s32.totalorder %s519_s1, %s519_s1 }
  0x1e   :  { %p526_p0 = por %p525_p13, %p524_p12 }
  0x20   :  { %p527_p1 = pnand %p526_p0, %p520_p11 }
  0x22   :  { %530 = shalt.err (!%p527_p1)
}
  0x23   :  { %22 = dma.hbm_to_vmem [thread:$0]  %s701_s0, 128, %s20_s8, [#allocation3]  }
  0x24   :  { %s531_s22 = scalar_lea.hbm %s704_s3, 2048 }
  0x25   :  { %p532_p2 = scmp.ne.s32.totalorder %s704_s3, %s531_s22  ;;  %p535_p3 = scmp.lt.u32.totalorder %s531_s22, %s704_s3 }
  0x27   :  { %p537_p4 = pnand %p535_p3, %p532_p2 }
  0x29   :  { %540 = shalt.err (!%p537_p4)
}
  0x2a   :  { %s541_s27 = scalar_lea.vmem %s43_s10, 2048  ;;  %p546_p6 = scmp.lt.s32.totalorder %s43_s10, %s43_s10 }
  0x2b   :  { %p542_p5 = scmp.ne.s32.totalorder %s43_s10, %s541_s27  ;;  %p547_p7 = scmp.lt.s32.totalorder %s541_s27, %s541_s27 }
  0x2d   :  { %p548_p8 = por %p547_p7, %p546_p6 }
  0x2f   :  { %p549_p9 = pnand %p548_p8, %p542_p5 }
  0x31   :  { %552 = shalt.err (!%p549_p9)
}
  0x32   :  { %48 = dma.hbm_to_vmem [thread:$0]  %s704_s3, 2048, %s43_s10, [#allocation6], %s582_s28, %s582_s28, %s583_s29  }
  0x33   :  { %575 = dma.done.wait [#allocation3], 128  }
  0x34   :  { %576 = vsyncadd [#allocation3], 4294967168 }
  0x35   :  { %577 = dma.done.wait [#allocation6], 4096  }
  0x36   :  { %578 = vsyncadd [#allocation6], 4294963200  ;;  %v586_v0 = vmov 0.0|0.0   ;;  %vm587_vm0 = vmmov 0   ;;  %v588_v1 = vmov 0.0   ;;  %v61_v2 = vld [vmem:[#allocation5] sm:$0xff]  ;;  %v78_v51 = vlaneseq }
  0x37   :  { %426 = vmatprep.subr.bf16.mxu0 %v586_v0  ;;  %388 = vmatprep.mubr.msk.f32.mxu0 %vm587_vm0, %v588_v1  ;;  %v62_v3 = vld [vmem:[#allocation5 + $0x8] sm:$0xff]  ;;  %v63_v4 = vld [vmem:[#allocation5 + $0x10] sm:$0xff]  ;;  %v64_v6 = vld [vmem:[#allocation5 + $0x18] sm:$0xff] }
  0x38   :  { %450 = vmatprep.subr.bf16.mxu1 %v586_v0  ;;  %423 = vmatprep.mubr.msk.f32.mxu1 %vm587_vm0, %v588_v1  ;;  %v427_v5 = vpack.c.bf16 %v62_v3, %v61_v2  ;;  %v430_v7 = vpack.c.bf16 %v64_v6, %v63_v4  ;;  %v65_v8 = vld [vmem:[#allocation5 + $0x20] sm:$0xff]  ;;  %v66_v9 = vld [vmem:[#allocation5 + $0x28] sm:$0xff]  ;;  %v67_v11 = vld [vmem:[#allocation5 + $0x30] sm:$0xff]  ;;  %v678_v52 = vshrl.u32 %v78_v51, 7 }
  0x39   :  { %v433_v10 = vpack.c.bf16 %v66_v9, %v65_v8  ;;  %v68_v12 = vld [vmem:[#allocation5 + $0x38] sm:$0xff]  ;;  %v69_v14 = vld [vmem:[#allocation5 + $0x40] sm:$0xff]  ;;  %v70_v15 = vld [vmem:[#allocation5 + $0x48] sm:$0xff] }
  0x3a   :  { %428 = vmatpush3.bf16.msra.mxu0 %v427_v5  ;;  %v436_v13 = vpack.c.bf16 %v68_v12, %v67_v11  ;;  %v439_v16 = vpack.c.bf16 %v70_v15, %v69_v14  ;;  %v71_v17 = vld [vmem:[#allocation5 + $0x50] sm:$0xff]  ;;  %v72_v18 = vld [vmem:[#allocation5 + $0x58] sm:$0xff]  ;;  %v73_v20 = vld [vmem:[#allocation5 + $0x60] sm:$0xff]  ;;  %v80_v53 = vsub.s32 0, %v678_v52  ;;  %v175_v14 = vsub.s32 1, %v678_v52 }
  0x3b   :  { %429 = vmatprep.subr.bf16.mxu0 %v586_v0  ;;  %v442_v19 = vpack.c.bf16 %v72_v18, %v71_v17  ;;  %v74_v21 = vld [vmem:[#allocation5 + $0x68] sm:$0xff]  ;;  %v75_v23 = vld [vmem:[#allocation5 + $0x70] sm:$0xff]  ;;  %v76_v24 = vld [vmem:[#allocation5 + $0x78] sm:$0xff]  ;;  %v180_v15 = vsub.s32 2, %v678_v52 }
  0x3c   :  { %v445_v22 = vpack.c.bf16 %v74_v21, %v73_v20  ;;  %v448_v25 = vpack.c.bf16 %v76_v24, %v75_v23  ;;  %v60_v26 = vld [vmem:[#allocation2] sm:$0xff]  ;;  %v183_v27 = vld [vmem:[#allocation7] sm:$0xff]  ;;  %v184_v28 = vld [vmem:[#allocation7 + $0x8] sm:$0xff] }
  0x3d   :  { %v451_v29 = vpack.c.bf16 %v184_v28, %v183_v27  ;;  %v185_v30 = vld [vmem:[#allocation7 + $0x10] sm:$0xff]  ;;  %v186_v31 = vld [vmem:[#allocation7 + $0x18] sm:$0xff]  ;;  %v187_v33 = vld [vmem:[#allocation7 + $0x20] sm:$0xff] }
  0x3e   :  { %431 = vmatpush3.bf16.msra.mxu0 %v430_v7  ;;  %v454_v32 = vpack.c.bf16 %v186_v31, %v185_v30  ;;  %v188_v34 = vld [vmem:[#allocation7 + $0x28] sm:$0xff]  ;;  %v189_v36 = vld [vmem:[#allocation7 + $0x30] sm:$0xff]  ;;  %v190_v37 = vld [vmem:[#allocation7 + $0x38] sm:$0xff] }
  0x3f   :  { %432 = vmatprep.subr.bf16.mxu0 %v586_v0  ;;  %452 = vmatpush3.bf16.msra.mxu1 %v451_v29  ;;  %v457_v35 = vpack.c.bf16 %v188_v34, %v187_v33  ;;  %v460_v38 = vpack.c.bf16 %v190_v37, %v189_v36  ;;  %v191_v39 = vld [vmem:[#allocation7 + $0x40] sm:$0xff]  ;;  %v192_v40 = vld [vmem:[#allocation7 + $0x48] sm:$0xff]  ;;  %v193_v42 = vld [vmem:[#allocation7 + $0x50] sm:$0xff] }
  0x40   :  { %453 = vmatprep.subr.bf16.mxu1 %v586_v0  ;;  %v463_v41 = vpack.c.bf16 %v192_v40, %v191_v39  ;;  %v194_v43 = vld [vmem:[#allocation7 + $0x58] sm:$0xff]  ;;  %v195_v45 = vld [vmem:[#allocation7 + $0x60] sm:$0xff]  ;;  %v196_v46 = vld [vmem:[#allocation7 + $0x68] sm:$0xff] }
  0x41   :  { %v466_v44 = vpack.c.bf16 %v194_v43, %v193_v42  ;;  %v469_v47 = vpack.c.bf16 %v196_v46, %v195_v45  ;;  %v197_v48 = vld [vmem:[#allocation7 + $0x70] sm:$0xff]  ;;  %v198_v49 = vld [vmem:[#allocation7 + $0x78] sm:$0xff] }
  0x42   :  { %434 = vmatpush3.bf16.msra.mxu0 %v433_v10  ;;  %v472_v50 = vpack.c.bf16 %v198_v49, %v197_v48  ;;  %v77_v54 = vld [vmem:[%s703_s2] sm:$0x7] }
  0x43   :  { %435 = vmatprep.subr.bf16.mxu0 %v586_v0  ;;  %455 = vmatpush3.bf16.msra.mxu1 %v454_v32  ;;  %v81_v55 = vrot.slane %v77_v54, %v80_v53 }
  0x44   :  { %456 = vmatprep.subr.bf16.mxu1 %v586_v0 }
  0x46   :  { %437 = vmatpush3.bf16.msra.mxu0 %v436_v13 }
  0x47   :  { %438 = vmatprep.subr.bf16.mxu0 %v586_v0  ;;  %458 = vmatpush3.bf16.msra.mxu1 %v457_v35 }
  0x48   :  { %459 = vmatprep.subr.bf16.mxu1 %v586_v0 }
  0x4a   :  { %440 = vmatpush3.bf16.msra.mxu0 %v439_v16  ;;  %v176_v16 = vrot.slane %v77_v54, %v175_v14 }
  0x4b   :  { %441 = vmatprep.subr.bf16.mxu0 %v586_v0  ;;  %461 = vmatpush3.bf16.msra.mxu1 %v460_v38 }
  0x4c   :  { %462 = vmatprep.subr.bf16.mxu1 %v586_v0 }
  0x4e   :  { %443 = vmatpush3.bf16.msra.mxu0 %v442_v19  ;;  %v181_v19 = vrot.slane %v77_v54, %v180_v15 }
  0x4f   :  { %444 = vmatprep.subr.bf16.mxu0 %v586_v0  ;;  %464 = vmatpush3.bf16.msra.mxu1 %v463_v41 }
  0x50   :  { %465 = vmatprep.subr.bf16.mxu1 %v586_v0 }
  0x52   :  { %446 = vmatpush3.bf16.msra.mxu0 %v445_v22  ;;  %v199_v22 = vld [vmem:[%s705_s4] sm:$0x7]  ;;  %s589_s4 = smov [#allocation8]  }
  0x53   :  { %447 = vmatprep.subr.bf16.mxu0 %v586_v0  ;;  %467 = vmatpush3.bf16.msra.mxu1 %v466_v44  ;;  %v203_v23 = vrot.slane %v199_v22, %v80_v53  ;;  %v298_v46 = vrot.slane %v199_v22, %v175_v14  ;;  %v303_v49 = vrot.slane %v199_v22, %v180_v15  ;;  %s312_s6 = sshll.u32 %s589_s4, 4  ;;  %s313_s6 = int_to_ptr.vmem [resolvable:$true] %s312_s6 }
  0x54   :  { %468 = vmatprep.subr.bf16.mxu1 %v586_v0  ;;  %s553_s7 = scalar_lea.vmem %s313_s6, 128  ;;  %p558_p11 = scmp.lt.s32.totalorder %s313_s6, %s313_s6 }
  0x55   :  { %p554_p10 = scmp.ne.s32.totalorder %s313_s6, %s553_s7  ;;  %p559_p12 = scmp.lt.s32.totalorder %s553_s7, %s553_s7 }
  0x56   :  { %449 = vmatpush3.bf16.msra.mxu0 %v448_v25 }
  0x57   :  { %470 = vmatpush3.bf16.msra.mxu1 %v469_v47  ;;  %p560_p13 = por %p559_p12, %p558_p11 }
  0x58   :  { %471 = vmatprep.subr.bf16.mxu1 %v586_v0 }
  0x59   :  { %389 = vmatmul.mubr.f32.vlgmr.msra.gmra.mrb[0].mxu0 %v60_v26  ;;  %p561_p0 = pnand %p560_p13, %p554_p10 }
  0x5b   :  { %473 = vmatpush3.bf16.msra.mxu1 %v472_v50 }
 0x12c   :  { %v148_v56 = vpop.f32.mrb[0].mxu0 }
 0x12d   :  { %v149_v57 = vadd.f32 %v148_v56, %v81_v55  ;;  %v390_v58 = vpop.f32.mrb[1].mxu0 }
 0x12f   :  { %v152_v59 = vmul.f32 0.1, %v149_v57 }
 0x131   :  { %v153_v60 = vmax.f32 %v149_v57, %v152_v59 }
 0x133   :  { %v154_v61 = vrot.slane %v153_v60, 4 }
 0x135   :  { %v155_v62 = vadd.f32 %v154_v61, %v153_v60 }
 0x137   :  { %v156_v63 = vrot.slane %v155_v62, 2 }
 0x139   :  { %v157_v0 = vadd.f32 %v156_v63, %v155_v62 }
 0x13b   :  { %v158_v1 = vrot.slane %v157_v0, 1 }
 0x13d   :  { %v159_v2 = vadd.f32 %v158_v1, %v157_v0 }
 0x13f   :  { %v160_v3 = vmul.f32 0.125, %v159_v2 }
 0x141   :  { %v161_v4 = vsub.f32 %v153_v60, %v160_v3 }
 0x143   :  { %v162_v5 = vmul.f32 %v161_v4, %v161_v4 }
 0x145   :  { %v163_v6 = vrot.slane %v162_v5, 4 }
 0x147   :  { %v164_v7 = vadd.f32 %v163_v6, %v162_v5 }
 0x149   :  { %v165_v8 = vrot.slane %v164_v7, 2 }
 0x14b   :  { %v166_v9 = vadd.f32 %v165_v8, %v164_v7 }
 0x14d   :  { %v167_v10 = vrot.slane %v166_v9, 1 }
 0x14f   :  { %v168_v11 = vadd.f32 %v167_v10, %v166_v9 }
 0x151   :  { %v169_v12 = vmul.f32 0.125, %v168_v11 }
 0x153   :  { %v170_v13 = vadd.f32 1e-05, %v169_v12 }
 0x155   :  { %483 = vrsqrt.f32 %v170_v13 }
 0x15f   :  { %v484_v17 = vpop.eup %483 }
 0x160   :  { %v172_v18 = vmul.f32 %v484_v17, %v161_v4 }
 0x162   :  { %v177_v20 = vmul.f32 %v176_v16, %v172_v18 }
 0x164   :  { %v182_v21 = vadd.f32 %v181_v19, %v177_v20 }
 0x166   :  { %424 = vmatmul.mubr.f32.vlgmr.msra.gmra.mrb[0].mxu1 %v182_v21 }
 0x239   :  { %v270_v24 = vpop.f32.mrb[0].mxu1 }
 0x23a   :  { %v271_v25 = vadd.f32 %v270_v24, %v203_v23  ;;  %v425_v26 = vpop.f32.mrb[1].mxu1 }
 0x23c   :  { %v274_v27 = vmul.f32 0.1, %v271_v25 }
 0x23e   :  { %v275_v28 = vmax.f32 %v271_v25, %v274_v27 }
 0x240   :  { %v276_v29 = vrot.slane %v275_v28, 4 }
 0x242   :  { %v277_v30 = vadd.f32 %v276_v29, %v275_v28 }
 0x244   :  { %v278_v31 = vrot.slane %v277_v30, 2 }
 0x246   :  { %v279_v32 = vadd.f32 %v278_v31, %v277_v30 }
 0x248   :  { %v280_v33 = vrot.slane %v279_v32, 1 }
 0x24a   :  { %v281_v34 = vadd.f32 %v280_v33, %v279_v32 }
 0x24c   :  { %v282_v35 = vmul.f32 0.125, %v281_v34 }
 0x24e   :  { %v283_v36 = vsub.f32 %v275_v28, %v282_v35 }
 0x250   :  { %v284_v37 = vmul.f32 %v283_v36, %v283_v36 }
 0x252   :  { %v285_v38 = vrot.slane %v284_v37, 4 }
 0x254   :  { %v286_v39 = vadd.f32 %v285_v38, %v284_v37 }
 0x256   :  { %v287_v40 = vrot.slane %v286_v39, 2 }
 0x258   :  { %v288_v41 = vadd.f32 %v287_v40, %v286_v39 }
 0x25a   :  { %v289_v42 = vrot.slane %v288_v41, 1 }
 0x25c   :  { %v290_v43 = vadd.f32 %v289_v42, %v288_v41 }
 0x25e   :  { %v291_v44 = vmul.f32 0.125, %v290_v43 }
 0x260   :  { %v292_v45 = vadd.f32 1e-05, %v291_v44 }
 0x262   :  { %485 = vrsqrt.f32 %v292_v45 }
 0x26c   :  { %v486_v47 = vpop.eup %485 }
 0x26d   :  { %v294_v48 = vmul.f32 %v486_v47, %v283_v36 }
 0x26f   :  { %v299_v50 = vmul.f32 %v298_v46, %v294_v48 }
 0x271   :  { %v304_v51 = vadd.f32 %v303_v49, %v299_v50 }
 0x273   :  { %305 = vst [vmem:[#allocation8] sm:$0xff] %v304_v51 }
 0x274   :  { %564 = shalt.err (!%p561_p0)
}
 0x275   :  { %s565_s10 = scalar_lea.hbm %s706_s5, 128 }
 0x276   :  { %p566_p1 = scmp.ne.s32.totalorder %s706_s5, %s565_s10  ;;  %p569_p2 = scmp.lt.u32.totalorder %s565_s10, %s706_s5 }
 0x278   :  { %p571_p3 = pnand %p569_p2, %p566_p1 }
 0x27a   :  { %574 = shalt.err (!%p571_p3)
}
 0x27b   :  { %315 = dma.vmem_to_hbm [thread:$0]  %s313_s6, 128, %s706_s5, [#allocation4]  }
 0x27c   :  { %579 = dma.done.wait [#allocation4], 128  }
 0x27d   :  { %580 = vsyncadd [#allocation4], 4294967168 }
 0x27e   :  { %319 = vsyncpa [#allocation3], 1 }
 0x27f   :  { %320 = vsyncpa [#allocation6], 1 }
 0x280   :  { %321 = vsyncpa [#allocation4], 1 }

</bundles_post_ra>
